<compile_context>
chip_gen: v7x
topology: tpu7x:2x2x1
jax: 0.10.0
libtpu: 0.0.40
codegen_flags: <defaults>
</compile_context>

<pallas_src>
import jax
import jax.numpy as jnp
from jax.experimental import pallas as pl
from jax.experimental.pallas import tpu as pltpu

NIN = 16
FCDIM = 64
NOUT = 10

# Bit-widths come from the checkpoint filename in the original script
# (e.g. "..._w8a8.pth"); fixed deterministically here.
BW_W = 8
BW_A = 8

# Lane-dense padded dims (vreg lane width = 128).
HPAD = 128   # hidden 64 -> 128
OPAD = 128   # output 10 -> 128 (sliced back to NOUT in the wrapper)

# Activation quantization: spec passes act_quant=Int8ActPerTensorFloat (signed).
ACT_QMAX = float(2 ** (BW_A - 1) - 1)
# TODO(synk): brevitas learns this per-tensor activation scale from data /
# checkpoint; we initialize it deterministically here.
ACT_SCALE = 6.0 / ACT_QMAX
ACT_INV_SCALE = 1.0 / ACT_SCALE

# Default batch tile (sweep 2048..8192). Must be a multiple of 16 so the bf16
# output tile packs sublanes cleanly (16 also satisfies the f32 x-tile's 8).
TB_MAX = 4096

# Above v5e's 16 MiB scoped default, comfortably below v7x's 64 MiB physical.
VMEM_LIMIT_BYTES = 48 * 1024 * 1024


def _cdiv(a, b):
    return -(-a // b)


def _round_up(x, m):
    return ((x + m - 1) // m) * m


def fake_quant_weight(w, bw):
    """Int8WeightPerTensorFloat-style per-tensor symmetric fake quantization.

    Abs-max scaling, narrow_range ([-qmax, qmax]); round-half-to-even matches
    torch.round. Epsilon avoids NaN for an all-zero weight tensor.
    """
    qmax = float(2 ** (bw - 1) - 1)
    scale = jnp.maximum(jnp.max(jnp.abs(w)), 1e-12) / qmax
    q = jnp.clip(jnp.round(w / scale), -qmax, qmax)
    return (q * scale).astype(jnp.float32)


def _relu_quant_codes(h):
    """QuantReLU with the activation scale folded into the weights.

    The matmul already produced h / ACT_SCALE (scale folded into the previous
    weight), so this is just relu -> round -> upper clip -> bf16. The lower
    clip is dead after ReLU; integer codes <= 127 are exact in bf16.
    """
    q = jnp.minimum(jnp.round(jnp.maximum(h, 0.0)), ACT_QMAX)
    return q.astype(jnp.bfloat16)


def mlp_kernel(x_ref, w1_ref, w2_ref, w3_ref, w4_ref, o_ref):
    """Fused 4-layer MLP: bf16 MXU matmuls (f32 accumulate) + ReLU fake-quant (VPU).

    x arrives as f32 and is cast to bf16 in-vreg (no separate HBM pass).
    Activation scales are pre-folded into W1 (1/S) and W4 (S).
    """
    x = x_ref[...].astype(jnp.bfloat16)
    h = jnp.dot(x, w1_ref[...], preferred_element_type=jnp.float32)       # = h1 / S
    q = _relu_quant_codes(h)
    h = jnp.dot(q, w2_ref[...], preferred_element_type=jnp.float32)       # = h2 / S
    q = _relu_quant_codes(h)
    h = jnp.dot(q, w3_ref[...], preferred_element_type=jnp.float32)       # = h3 / S
    q = _relu_quant_codes(h)
    o_ref[...] = jnp.dot(q, w4_ref[...],
                         preferred_element_type=jnp.float32).astype(o_ref.dtype)


def prepare_weights(w1, w2, w3, w4):
    """Fake-quantize, transpose to (in, out), fold act scales, pad lane-dense, bf16.

    For real inference call this ONCE (weights are static) and reuse the result.
    Scale folding: W1' = W1_q / S, W2' = W2_q, W3' = W3_q, W4' = W4_q * S —
    the S / (1/S) pair cancels between consecutive layers.
    """
    def prep(w, in_pad, out_pad, scale=1.0):
        wq = fake_quant_weight(jnp.asarray(w, jnp.float32), BW_W).T * scale  # (in, out)
        wq = jnp.pad(wq, ((0, in_pad - wq.shape[0]), (0, out_pad - wq.shape[1])))
        return wq.astype(jnp.bfloat16)

    W1 = prep(w1, NIN * NIN, HPAD, ACT_INV_SCALE)   # (256, 128)
    W2 = prep(w2, HPAD, HPAD)                       # (128, 128)
    W3 = prep(w3, HPAD, HPAD)                       # (128, 128)
    W4 = prep(w4, HPAD, OPAD, ACT_SCALE)            # (128, 128)
    return W1, W2, W3, W4


def _choose_batch_tile(B):
    """>=2 grid steps whenever possible (v7x megacore), capped at TB_MAX."""
    return min(TB_MAX, max(16, _round_up(_cdiv(B, 2), 16)))


def quantized_mlp_prepared(x_nchw, W1, W2, W3, W4):
    """x_nchw: (B, 1, NIN, NIN); W*: prepared (folded, padded, bf16) weights."""
    B = x_nchw.shape[0]
    # nn.Flatten(): (B, 1, 16, 16) -> (B, 256). Kept in f32 — the kernel casts
    # to bf16 in-vreg, avoiding an extra un-fused HBM convert pass.
    x2d = jnp.asarray(x_nchw, jnp.float32).reshape(B, NIN * NIN)

    tb = _choose_batch_tile(B)
    b_pad = _round_up(B, tb)
    if b_pad != B:
        x2d = jnp.pad(x2d, ((0, b_pad - B), (0, 0)))
    grid = (b_pad // tb,)

    out = pl.pallas_call(
        mlp_kernel,
        # bf16 output halves the kernel writeback and the post-kernel slice read.
        out_shape=jax.ShapeDtypeStruct((b_pad, OPAD), jnp.bfloat16),
        grid_spec=pltpu.PrefetchScalarGridSpec(
            num_scalar_prefetch=0,
            grid=grid,
            in_specs=[
                # Batch-tiled activations: double-buffered behind the matmuls.
                pl.BlockSpec((tb, NIN * NIN), lambda i: (i, 0)),
                # Weights: constant block index -> DMA'd once, VMEM-resident.
                pl.BlockSpec((NIN * NIN, HPAD), lambda i: (0, 0)),
                pl.BlockSpec((HPAD, HPAD), lambda i: (0, 0)),
                pl.BlockSpec((HPAD, HPAD), lambda i: (0, 0)),
                pl.BlockSpec((HPAD, OPAD), lambda i: (0, 0)),
            ],
            out_specs=pl.BlockSpec((tb, OPAD), lambda i: (i, 0)),
        ),
        compiler_params=pltpu.CompilerParams(
            # Batch tiles are independent -> megacore sharding on v7x (2 TCs).
            dimension_semantics=("parallel",),
            # ~16-18 MiB used at tb=4096; > v5e's 16 MiB default, < v7x's 64 MiB.
            vmem_limit_bytes=VMEM_LIMIT_BYTES,
        ),
    )(x2d, W1, W2, W3, W4)

    # Slice as late as possible; padded rows/lanes are dropped here.
    return out[:B, :NOUT].astype(jnp.float32)


@jax.jit
def quantized_mlp(x_nchw, w1, w2, w3, w4):
    """x_nchw: (B, 1, NIN, NIN) float32; w*: torch-layout (out, in) float32."""
    W1, W2, W3, W4 = prepare_weights(w1, w2, w3, w4)
    return quantized_mlp_prepared(x_nchw, W1, W2, W3, W4)


def quantized_mlp_ref(x_nchw, w1, w2, w3, w4):
    """Pure-JAX reference with the same folded-scale / bf16 math (no Pallas)."""
    B = x_nchw.shape[0]
    x = jnp.asarray(x_nchw, jnp.float32).reshape(B, NIN * NIN).astype(jnp.bfloat16)
    W1, W2, W3, W4 = prepare_weights(w1, w2, w3, w4)
    h = jnp.dot(x, W1, preferred_element_type=jnp.float32)
    q = _relu_quant_codes(h)
    h = jnp.dot(q, W2, preferred_element_type=jnp.float32)
    q = _relu_quant_codes(h)
    h = jnp.dot(q, W3, preferred_element_type=jnp.float32)
    q = _relu_quant_codes(h)
    out = jnp.dot(q, W4, preferred_element_type=jnp.float32).astype(jnp.bfloat16)
    return out[:, :NOUT].astype(jnp.float32)


if __name__ == "__main__":
    key = jax.random.PRNGKey(0)
    k_x, k1, k2, k3, k4 = jax.random.split(key, 5)

    # torch nn.Linear weight layout: (out_features, in_features); kaiming-ish init.
    def init_w(k, out_f, in_f):
        return jax.random.normal(k, (out_f, in_f), dtype=jnp.float32) / jnp.sqrt(in_f)

    w1 = init_w(k1, FCDIM, NIN * NIN)
    w2 = init_w(k2, FCDIM, FCDIM)
    w3 = init_w(k3, FCDIM, FCDIM)
    w4 = init_w(k4, NOUT, FCDIM)

    # Small primary check (single grid step).
    B = 2
    x = jax.random.normal(k_x, (B, 1, NIN, NIN), dtype=jnp.float32)
    out = quantized_mlp(x, w1, w2, w3, w4)
    jax.block_until_ready(out)
    assert out.shape == (B, NOUT) and out.dtype == jnp.float32
    assert bool(jnp.all(jnp.isfinite(out)))
    ref = quantized_mlp_ref(x, w1, w2, w3, w4)
    # Loose tolerance: a single round-half flip in the 8-bit fake-quant can
    # shift an output by a few activation LSBs.
    assert jnp.allclose(out, ref, atol=0.5, rtol=0.0), (out, ref)

    # Secondary check exercising a multi-step grid (batch padding + pipelining).
    B2 = 40
    x2 = jax.random.normal(k_x, (B2, 1, NIN, NIN), dtype=jnp.float32)
    out2 = quantized_mlp(x2, w1, w2, w3, w4)
    jax.block_until_ready(out2)
    ref2 = quantized_mlp_ref(x2, w1, w2, w3, w4)
    assert out2.shape == (B2, NOUT)
    assert bool(jnp.all(jnp.isfinite(out2)))
    assert jnp.allclose(out2, ref2, atol=0.5, rtol=0.0), (out2, ref2)

    print("KERNEL_OK")
</pallas_src>

<mosaic_0001>
module attributes {stable_mosaic.version = 11 : i64} {
  func.func @mlp_kernel(%arg0: i32, %arg1: memref<16x256xf32, #tpu.memory_space<vmem>>, %arg2: memref<256x128xbf16, #tpu.memory_space<vmem>>, %arg3: memref<128x128xbf16, #tpu.memory_space<vmem>>, %arg4: memref<128x128xbf16, #tpu.memory_space<vmem>>, %arg5: memref<128x128xbf16, #tpu.memory_space<vmem>>, %arg6: memref<16x128xbf16, #tpu.memory_space<vmem>>) attributes {dimension_semantics = [#tpu.dimension_semantics<parallel>], iteration_bounds = array<i64: 1>, scalar_prefetch = 0 : i64, scratch_operands = 0 : i64, tpu.core_type = #tpu.core_type<tc>, window_params = [{transform_indices = @transform_0, window_bounds = array<i64: 16, 256>}, {pipeline_mode = #tpu.pipeline_mode<synchronous>, transform_indices = @transform_1, window_bounds = array<i64: 256, 128>}, {pipeline_mode = #tpu.pipeline_mode<synchronous>, transform_indices = @transform_2, window_bounds = array<i64: 128, 128>}, {pipeline_mode = #tpu.pipeline_mode<synchronous>, transform_indices = @transform_3, window_bounds = array<i64: 128, 128>}, {pipeline_mode = #tpu.pipeline_mode<synchronous>, transform_indices = @transform_4, window_bounds = array<i64: 128, 128>}, {transform_indices = @transform_5, window_bounds = array<i64: 16, 128>}]} {
    %c0 = arith.constant 0 : index
    %c0_0 = arith.constant 0 : index
    %0 = vector.load %arg1[%c0, %c0_0] : memref<16x256xf32, #tpu.memory_space<vmem>>, vector<16x256xf32>
    %1 = arith.truncf %0 : vector<16x256xf32> to vector<16x256xbf16>
    %c0_1 = arith.constant 0 : index
    %c0_2 = arith.constant 0 : index
    %2 = vector.load %arg2[%c0_1, %c0_2] : memref<256x128xbf16, #tpu.memory_space<vmem>>, vector<256x128xbf16>
    %cst = arith.constant dense<0.000000e+00> : vector<16x128xf32>
    %3 = tpu.matmul %1, %2, %cst {dimension_numbers = #tpu.dot_dimension_numbers<[1], [0], [0], [1], [0, 0, 1, 1], [], []>} : vector<16x256xbf16>, vector<256x128xbf16>, vector<16x128xf32> -> vector<16x128xf32>
    %cst_3 = arith.constant 0.000000e+00 : f32
    %4 = vector.broadcast %cst_3 : f32 to vector<16x128xf32>
    %5 = arith.maximumf %3, %4 : vector<16x128xf32>
    %6 = math.roundeven %5 : vector<16x128xf32>
    %cst_4 = arith.constant 1.270000e+02 : f32
    %7 = vector.broadcast %cst_4 : f32 to vector<16x128xf32>
    %8 = arith.minimumf %6, %7 : vector<16x128xf32>
    %9 = arith.truncf %8 : vector<16x128xf32> to vector<16x128xbf16>
    %c0_5 = arith.constant 0 : index
    %c0_6 = arith.constant 0 : index
    %10 = vector.load %arg3[%c0_5, %c0_6] : memref<128x128xbf16, #tpu.memory_space<vmem>>, vector<128x128xbf16>
    %cst_7 = arith.constant dense<0.000000e+00> : vector<16x128xf32>
    %11 = tpu.matmul %9, %10, %cst_7 {dimension_numbers = #tpu.dot_dimension_numbers<[1], [0], [0], [1], [0, 0, 1, 1], [], []>} : vector<16x128xbf16>, vector<128x128xbf16>, vector<16x128xf32> -> vector<16x128xf32>
    %cst_8 = arith.constant 0.000000e+00 : f32
    %12 = vector.broadcast %cst_8 : f32 to vector<16x128xf32>
    %13 = arith.maximumf %11, %12 : vector<16x128xf32>
    %14 = math.roundeven %13 : vector<16x128xf32>
    %cst_9 = arith.constant 1.270000e+02 : f32
    %15 = vector.broadcast %cst_9 : f32 to vector<16x128xf32>
    %16 = arith.minimumf %14, %15 : vector<16x128xf32>
    %17 = arith.truncf %16 : vector<16x128xf32> to vector<16x128xbf16>
    %c0_10 = arith.constant 0 : index
    %c0_11 = arith.constant 0 : index
    %18 = vector.load %arg4[%c0_10, %c0_11] : memref<128x128xbf16, #tpu.memory_space<vmem>>, vector<128x128xbf16>
    %cst_12 = arith.constant dense<0.000000e+00> : vector<16x128xf32>
    %19 = tpu.matmul %17, %18, %cst_12 {dimension_numbers = #tpu.dot_dimension_numbers<[1], [0], [0], [1], [0, 0, 1, 1], [], []>} : vector<16x128xbf16>, vector<128x128xbf16>, vector<16x128xf32> -> vector<16x128xf32>
    %cst_13 = arith.constant 0.000000e+00 : f32
    %20 = vector.broadcast %cst_13 : f32 to vector<16x128xf32>
    %21 = arith.maximumf %19, %20 : vector<16x128xf32>
    %22 = math.roundeven %21 : vector<16x128xf32>
    %cst_14 = arith.constant 1.270000e+02 : f32
    %23 = vector.broadcast %cst_14 : f32 to vector<16x128xf32>
    %24 = arith.minimumf %22, %23 : vector<16x128xf32>
    %25 = arith.truncf %24 : vector<16x128xf32> to vector<16x128xbf16>
    %c0_15 = arith.constant 0 : index
    %c0_16 = arith.constant 0 : index
    %26 = vector.load %arg5[%c0_15, %c0_16] : memref<128x128xbf16, #tpu.memory_space<vmem>>, vector<128x128xbf16>
    %cst_17 = arith.constant dense<0.000000e+00> : vector<16x128xf32>
    %27 = tpu.matmul %25, %26, %cst_17 {dimension_numbers = #tpu.dot_dimension_numbers<[1], [0], [0], [1], [0, 0, 1, 1], [], []>} : vector<16x128xbf16>, vector<128x128xbf16>, vector<16x128xf32> -> vector<16x128xf32>
    %28 = arith.truncf %27 : vector<16x128xf32> to vector<16x128xbf16>
    %c0_18 = arith.constant 0 : index
    %c0_19 = arith.constant 0 : index
    %29 = vector.load %arg6[%c0_18, %c0_19] : memref<16x128xbf16, #tpu.memory_space<vmem>>, vector<16x128xbf16>
    tpu.vector_store %arg6[%c0_18, %c0_19], %28 {strides = array<i32>} : memref<16x128xbf16, #tpu.memory_space<vmem>>, vector<16x128xbf16>,
    return
  }
  func.func @transform_0(%arg0: i32) -> (i32, i32) {
    %c0_i32 = arith.constant 0 : i32
    %c0_i32_0 = arith.constant 0 : i32
    return %arg0, %c0_i32 : i32, i32
  }
  func.func @transform_1(%arg0: i32) -> (i32, i32) {
    %c0_i32 = arith.constant 0 : i32
    %c0_i32_0 = arith.constant 0 : i32
    %c0_i32_1 = arith.constant 0 : i32
    return %c0_i32, %c0_i32_0 : i32, i32
  }
  func.func @transform_2(%arg0: i32) -> (i32, i32) {
    %c0_i32 = arith.constant 0 : i32
    %c0_i32_0 = arith.constant 0 : i32
    %c0_i32_1 = arith.constant 0 : i32
    return %c0_i32, %c0_i32_0 : i32, i32
  }
  func.func @transform_3(%arg0: i32) -> (i32, i32) {
    %c0_i32 = arith.constant 0 : i32
    %c0_i32_0 = arith.constant 0 : i32
    %c0_i32_1 = arith.constant 0 : i32
    return %c0_i32, %c0_i32_0 : i32, i32
  }
  func.func @transform_4(%arg0: i32) -> (i32, i32) {
    %c0_i32 = arith.constant 0 : i32
    %c0_i32_0 = arith.constant 0 : i32
    %c0_i32_1 = arith.constant 0 : i32
    return %c0_i32, %c0_i32_0 : i32, i32
  }
  func.func @transform_5(%arg0: i32) -> (i32, i32) {
    %c0_i32 = arith.constant 0 : i32
    %c0_i32_0 = arith.constant 0 : i32
    return %arg0, %c0_i32 : i32, i32
  }
}

</mosaic_0001>

<bundles_post_ra>
// kernel: quantized_mlp.1
= control target key start
LH: loop header
LB: loop body
LE: loop exit
PB: predicated region body
PF: predicated region fallthrough
CT: control target
= control target key end

     0   :  { %v752_v1 = vmov 0.0   ;;  %vm753_vm0 = vmmov 0   ;;  %s949_s1 = inlined_call_operand.vmem [shape: bf16[256,128], index: 1, kind: input, shape index: {}]   ;;  %s950_s0 = inlined_call_operand.vmem [shape: f32[16,256], index: 0, kind: input, shape index: {}]   ;;  %s951_s2 = inlined_call_operand.vmem [shape: bf16[128,128], index: 2, kind: input, shape index: {}]   ;;  %s952_s3 = inlined_call_operand.vmem [shape: bf16[128,128], index: 3, kind: input, shape index: {}]   ;;  %s953_s4 = inlined_call_operand.vmem [shape: bf16[128,128], index: 4, kind: input, shape index: {}]   ;;  %s954_s5 = inlined_call_operand.vmem [shape: bf16[16,128], index: 5, kind: output, shape index: {}]  }
   0x1   :  { %v712_v0 = vld [vmem:[%s949_s1 + $0x40] sm:$0xff]   ;;  %644 = vmatprep.subr.bf16.mxu1 %v752_v1  ;;  %v714_v3 = vld [vmem:[%s949_s1 + $0x48] sm:$0xff]   ;;  %v716_v5 = vld [vmem:[%s949_s1 + $0x50] sm:$0xff]   ;;  %660 = vmatprep.mubr.msk.bf16.mxu1 %vm753_vm0, %v752_v1 }
   0x2   :  { %v713_v2 = vld [vmem:[%s949_s1] sm:$0xff]   ;;  %595 = vmatprep.subr.bf16.mxu0 %v712_v0  ;;  %v715_v4 = vld [vmem:[%s949_s1 + $0x8] sm:$0xff]   ;;  %v717_v6 = vld [vmem:[%s949_s1 + $0x10] sm:$0xff]  }
   0x3   :  { %596 = vmatpush3.bf16.msra.mxu0 %v713_v2  ;;  %v718_v7 = vld [vmem:[%s949_s1 + $0x58] sm:$0xff]   ;;  %v720_v9 = vld [vmem:[%s949_s1 + $0x60] sm:$0xff]   ;;  %v722_v11 = vld [vmem:[%s949_s1 + $0x68] sm:$0xff]  }
   0x4   :  { %597 = vmatprep.subr.bf16.mxu0 %v714_v3  ;;  %v719_v8 = vld [vmem:[%s949_s1 + $0x18] sm:$0xff]   ;;  %v721_v10 = vld [vmem:[%s949_s1 + $0x20] sm:$0xff]   ;;  %v22_v12 = vld [vmem:[%s950_s0 + $0x8] sm:$0xff] }
   0x5   :  { %v24_v13 = vld [vmem:[%s950_s0 + $0x18] sm:$0xff]  ;;  %v723_v14 = vld [vmem:[%s949_s1 + $0x28] sm:$0xff]   ;;  %v728_v16 = vld [vmem:[%s951_s2] sm:$0xff]  }
   0x6   :  { %v26_v15 = vpack.c.bf16 %v24_v13, %v22_v12  ;;  %v724_v17 = vld [vmem:[%s949_s1 + $0x70] sm:$0xff]   ;;  %645 = vmatpush3.bf16.msra.mxu1 %v728_v16  ;;  %v729_v18 = vld [vmem:[%s951_s2 + $0x8] sm:$0xff]   ;;  %v726_v20 = vld [vmem:[%s949_s1 + $0x78] sm:$0xff]  }
   0x7   :  { %598 = vmatpush3.bf16.msra.mxu0 %v715_v4  ;;  %646 = vmatprep.subr.bf16.mxu1 %v752_v1  ;;  %v725_v19 = vld [vmem:[%s949_s1 + $0x30] sm:$0xff]   ;;  %v727_v22 = vld [vmem:[%s949_s1 + $0x38] sm:$0xff]   ;;  %v21_v23 = vld [vmem:[%s950_s0] sm:$0xff] }
   0x8   :  { %599 = vmatprep.subr.bf16.mxu0 %v716_v5  ;;  %187 = vmatprep.mubr.bf16.mxu0 %v26_v15  ;;  %v730_v21 = vld [vmem:[%s951_s2 + $0x10] sm:$0xff]   ;;  %v731_v25 = vld [vmem:[%s951_s2 + $0x18] sm:$0xff]   ;;  %v732_v27 = vld [vmem:[%s951_s2 + $0x20] sm:$0xff]  }
   0x9   :  { %v23_v24 = vld [vmem:[%s950_s0 + $0x10] sm:$0xff]  ;;  %v733_v28 = vld [vmem:[%s951_s2 + $0x28] sm:$0xff]   ;;  %v735_v30 = vld [vmem:[%s951_s2 + $0x38] sm:$0xff]  }
   0xa   :  { %647 = vmatpush3.bf16.msra.mxu1 %v729_v18  ;;  %v25_v26 = vpack.c.bf16 %v23_v24, %v21_v23  ;;  %v734_v29 = vld [vmem:[%s951_s2 + $0x30] sm:$0xff]   ;;  %v736_v31 = vld [vmem:[%s952_s3] sm:$0xff]   ;;  %v737_v32 = vld [vmem:[%s952_s3 + $0x8] sm:$0xff]  }
   0xb   :  { %600 = vmatpush3.bf16.msra.mxu0 %v717_v6  ;;  %648 = vmatprep.subr.bf16.mxu1 %v752_v1  ;;  %v738_v33 = vld [vmem:[%s952_s3 + $0x10] sm:$0xff]   ;;  %v739_v34 = vld [vmem:[%s952_s3 + $0x18] sm:$0xff]   ;;  %v740_v35 = vld [vmem:[%s952_s3 + $0x20] sm:$0xff]  }
   0xc   :  { %601 = vmatprep.subr.bf16.mxu0 %v718_v7  ;;  %v741_v49 = vld [vmem:[%s952_s3 + $0x28] sm:$0xff]   ;;  %v742_v50 = vld [vmem:[%s952_s3 + $0x30] sm:$0xff]   ;;  %v743_v51 = vld [vmem:[%s952_s3 + $0x38] sm:$0xff]  }
   0xd   :  { %v744_v52 = vld [vmem:[%s953_s4] sm:$0xff]   ;;  %v745_v53 = vld [vmem:[%s953_s4 + $0x8] sm:$0xff]   ;;  %v746_v54 = vld [vmem:[%s953_s4 + $0x10] sm:$0xff]  }
   0xe   :  { %649 = vmatpush3.bf16.msra.mxu1 %v730_v21  ;;  %v747_v55 = vld [vmem:[%s953_s4 + $0x18] sm:$0xff]   ;;  %v748_v56 = vld [vmem:[%s953_s4 + $0x20] sm:$0xff]   ;;  %v749_v5 = vld [vmem:[%s953_s4 + $0x28] sm:$0xff]  }
   0xf   :  { %602 = vmatpush3.bf16.msra.mxu0 %v719_v8  ;;  %650 = vmatprep.subr.bf16.mxu1 %v752_v1  ;;  %v750_v6 = vld [vmem:[%s953_s4 + $0x30] sm:$0xff]   ;;  %v751_v7 = vld [vmem:[%s953_s4 + $0x38] sm:$0xff]  }
  0x10   :  { %603 = vmatprep.subr.bf16.mxu0 %v720_v9 }
  0x12   :  { %651 = vmatpush3.bf16.msra.mxu1 %v731_v25 }
  0x13   :  { %604 = vmatpush3.bf16.msra.mxu0 %v721_v10  ;;  %652 = vmatprep.subr.bf16.mxu1 %v752_v1 }
  0x14   :  { %605 = vmatprep.subr.bf16.mxu0 %v722_v11 }
  0x16   :  { %653 = vmatpush3.bf16.msra.mxu1 %v732_v27 }
  0x17   :  { %606 = vmatpush3.bf16.msra.mxu0 %v723_v14  ;;  %654 = vmatprep.subr.bf16.mxu1 %v752_v1 }
  0x18   :  { %607 = vmatprep.subr.bf16.mxu0 %v724_v17 }
  0x1a   :  { %655 = vmatpush3.bf16.msra.mxu1 %v733_v28 }
  0x1b   :  { %608 = vmatpush3.bf16.msra.mxu0 %v725_v19  ;;  %656 = vmatprep.subr.bf16.mxu1 %v752_v1 }
  0x1c   :  { %609 = vmatprep.subr.bf16.mxu0 %v726_v20 }
  0x1e   :  { %657 = vmatpush3.bf16.msra.mxu1 %v734_v29 }
  0x1f   :  { %610 = vmatpush3.bf16.msra.mxu0 %v727_v22  ;;  %658 = vmatprep.subr.bf16.mxu1 %v752_v1 }
  0x20   :  { %664 = vmatprep.subr.bf16.mxu0 %v752_v1 }
  0x22   :  { %188 = vmatmul.mubr.bf16.vlgmr.msra.gmra.mrb[0].mxu0 %v25_v26  ;;  %659 = vmatpush3.bf16.msra.mxu1 %v735_v30 }
  0x23   :  { %680 = vmatprep.mubr.msk.bf16.mxu0 %vm753_vm0, %v752_v1  ;;  %684 = vmatprep.subr.bf16.mxu1 %v752_v1 }
  0x24   :  { %665 = vmatpush3.bf16.msra.mxu0 %v736_v31 }
  0x25   :  { %666 = vmatprep.subr.bf16.mxu0 %v752_v1 }
  0x28   :  { %667 = vmatpush3.bf16.msra.mxu0 %v737_v32 }
  0x29   :  { %668 = vmatprep.subr.bf16.mxu0 %v752_v1 }
  0x2c   :  { %669 = vmatpush3.bf16.msra.mxu0 %v738_v33 }
  0x2d   :  { %670 = vmatprep.subr.bf16.mxu0 %v752_v1 }
  0x30   :  { %671 = vmatpush3.bf16.msra.mxu0 %v739_v34 }
  0x31   :  { %672 = vmatprep.subr.bf16.mxu0 %v752_v1 }
  0x34   :  { %673 = vmatpush3.bf16.msra.mxu0 %v740_v35 }
  0x35   :  { %674 = vmatprep.subr.bf16.mxu0 %v752_v1 }
  0x38   :  { %675 = vmatpush3.bf16.msra.mxu0 %v741_v49 }
  0x39   :  { %676 = vmatprep.subr.bf16.mxu0 %v752_v1 }
  0x3c   :  { %677 = vmatpush3.bf16.msra.mxu0 %v742_v50 }
  0x3d   :  { %678 = vmatprep.subr.bf16.mxu0 %v752_v1 }
  0x40   :  { %679 = vmatpush3.bf16.msra.mxu0 %v743_v51 }
  0xf5   :  { %v611_v36 = vpop.f32.mrb[0].mxu0 }
  0xf6   :  { %v612_v37 = vpop.f32.mrb[1].mxu0 }
  0xf7   :  { %v613_v38 = vadd.f32 %v612_v37, %v611_v36  ;;  %v614_v39 = vpop.f32.mrb[2].mxu0 }
  0xf8   :  { %v615_v40 = vpop.f32.mrb[3].mxu0 }
  0xf9   :  { %v196_v41 = vmax.f32 %v613_v38, 0.0  ;;  %v616_v42 = vadd.f32 %v615_v40, %v614_v39 }
  0xfb   :  { %v704_v43 = vround.rtne.f32 %v196_v41  ;;  %v197_v44 = vmax.f32 %v616_v42, 0.0 }
  0xfd   :  { %v705_v45 = vround.rtne.f32 %v197_v44  ;;  %v200_v46 = vmin.f32 %v704_v43, 127.0 }
  0xff   :  { %v201_v47 = vmin.f32 %v705_v45, 127.0 }
 0x101   :  { %v202_v48 = vpack.c.bf16 %v201_v47, %v200_v46 }
 0x103   :  { %661 = vmatmul.mubr.bf16.vlgmr.msra.gmra.mrb[0].mxu1 %v202_v48 }
 0x104   :  { %700 = vmatprep.mubr.msk.bf16.mxu1 %vm753_vm0, %v752_v1  ;;  %685 = vmatpush3.bf16.msra.mxu1 %v744_v52 }
 0x105   :  { %686 = vmatprep.subr.bf16.mxu1 %v752_v1 }
 0x108   :  { %687 = vmatpush3.bf16.msra.mxu1 %v745_v53 }
 0x109   :  { %688 = vmatprep.subr.bf16.mxu1 %v752_v1 }
 0x10c   :  { %689 = vmatpush3.bf16.msra.mxu1 %v746_v54 }
 0x10d   :  { %690 = vmatprep.subr.bf16.mxu1 %v752_v1 }
 0x110   :  { %691 = vmatpush3.bf16.msra.mxu1 %v747_v55 }
 0x111   :  { %692 = vmatprep.subr.bf16.mxu1 %v752_v1 }
 0x114   :  { %693 = vmatpush3.bf16.msra.mxu1 %v748_v56 }
 0x115   :  { %694 = vmatprep.subr.bf16.mxu1 %v752_v1 }
 0x118   :  { %695 = vmatpush3.bf16.msra.mxu1 %v749_v5 }
 0x119   :  { %696 = vmatprep.subr.bf16.mxu1 %v752_v1 }
 0x11c   :  { %697 = vmatpush3.bf16.msra.mxu1 %v750_v6 }
 0x11d   :  { %698 = vmatprep.subr.bf16.mxu1 %v752_v1 }
 0x120   :  { %699 = vmatpush3.bf16.msra.mxu1 %v751_v7 }
 0x1d6   :  { %v301_v57 = vpop.f32.mrb[0].mxu1 }
 0x1d7   :  { %v308_v58 = vmax.f32 %v301_v57, 0.0  ;;  %v662_v59 = vpop.f32.mrb[1].mxu1 }
 0x1d8   :  { %v304_v60 = vpop.f32.mrb[2].mxu1 }
 0x1d9   :  { %v706_v61 = vround.rtne.f32 %v308_v58  ;;  %v309_v62 = vmax.f32 %v304_v60, 0.0  ;;  %v663_v63 = vpop.f32.mrb[3].mxu1 }
 0x1db   :  { %v707_v0 = vround.rtne.f32 %v309_v62  ;;  %v312_v2 = vmin.f32 %v706_v61, 127.0 }
 0x1dd   :  { %v313_v3 = vmin.f32 %v707_v0, 127.0 }
 0x1df   :  { %v314_v4 = vpack.c.bf16 %v313_v3, %v312_v2 }
 0x1e1   :  { %681 = vmatmul.mubr.bf16.vlgmr.msra.gmra.mrb[4].mxu0 %v314_v4 }
 0x2b4   :  { %v413_v8 = vpop.f32.mrb[4].mxu0 }
 0x2b5   :  { %v420_v9 = vmax.f32 %v413_v8, 0.0  ;;  %v682_v10 = vpop.f32.mrb[5].mxu0 }
 0x2b6   :  { %v416_v11 = vpop.f32.mrb[6].mxu0 }
 0x2b7   :  { %v708_v12 = vround.rtne.f32 %v420_v9  ;;  %v421_v13 = vmax.f32 %v416_v11, 0.0  ;;  %v683_v14 = vpop.f32.mrb[7].mxu0 }
 0x2b9   :  { %v709_v15 = vround.rtne.f32 %v421_v13  ;;  %v424_v16 = vmin.f32 %v708_v12, 127.0 }
 0x2bb   :  { %v425_v17 = vmin.f32 %v709_v15, 127.0 }
 0x2bd   :  { %v426_v18 = vpack.c.bf16 %v425_v17, %v424_v16 }
 0x2bf   :  { %701 = vmatmul.mubr.bf16.vlgmr.msra.gmra.mrb[4].mxu1 %v426_v18 }
 0x392   :  { %v525_v19 = vpop.f32.mrb[4].mxu1 }
 0x393   :  { %v702_v20 = vpop.f32.mrb[5].mxu1 }
 0x394   :  { %v528_v1 = vpop.f32.mrb[6].mxu1 }
 0x395   :  { %v593_v21 = vpack.c.bf16 %v528_v1, %v525_v19  ;;  %v703_v22 = vpop.f32.mrb[7].mxu1 }
 0x397   :  { %594 = vst [vmem:[%s954_s5] sm:$0xff] %v593_v21  }

</bundles_post_ra>
